<compile_context>
chip_gen: v7x
topology: tpu7x:2x2x1
jax: 0.10.0
libtpu: 0.0.40
codegen_flags: <defaults>
</compile_context>

<pallas_src>
import math

import jax
import jax.numpy as jnp
from jax.experimental import pallas as pl
from jax.experimental.pallas import tpu as pltpu

EPS = 1e-5
LANE = 128             # lane width: channel / K dims padded to multiples of this

_TILE_CFG = None


def _round_up(x: int, m: int) -> int:
    return (x + m - 1) // m * m


def _tile_config():
    """Generation-dependent (max_tile_m, vmem_limit_bytes)."""
    global _TILE_CFG
    if _TILE_CFG is None:
        try:
            vmem = int(pltpu.get_tpu_info().vmem_capacity_bytes)
        except Exception:
            vmem = 64 * 1024 * 1024
        if vmem >= 128 * 1024 * 1024:
            # v5e / v6e (128 MiB VMEM): bigger tiles amortize the ~0.35 us grid-step cost.
            _TILE_CFG = (1024, 96 * 1024 * 1024)
        else:
            # v7x (64 MiB / TC): keep 512-row tiles and leave VMEM headroom.
            _TILE_CFG = (512, 48 * 1024 * 1024)
    return _TILE_CFG


# ----------------------------------------------------------------------------
# Pass 1: conv-as-matmul on the MXU (bf16 in, f32 acc) + packed per-tile BN partials
# ----------------------------------------------------------------------------
def _conv_stats_kernel(p_ref, w_ref, y_ref, stats_ref):
    # p_ref: (TILE_M, K_pad) bf16   w_ref: (K_pad, C_pad) bf16
    y = jnp.dot(p_ref[...], w_ref[...], preferred_element_type=jnp.float32)
    # Stats come from the f32 accumulator; the HBM round-trip of y is bf16.
    y_ref[...] = y.astype(y_ref.dtype)
    c = y.shape[-1]
    s = jnp.sum(y, axis=0, keepdims=True)         # (1, C_pad) per-tile sum
    sq = jnp.sum(y * y, axis=0, keepdims=True)    # (1, C_pad) per-tile sum of squares
    # One packed (16, C_pad) block: sum broadcast into rows 0-7, ssq into rows 8-15.
    stats_ref[...] = jnp.concatenate(
        [jnp.broadcast_to(s, (8, c)), jnp.broadcast_to(sq, (8, c))], axis=0)


# ----------------------------------------------------------------------------
# Pass 2: folded-BN affine (+ residual) (+ ReLU) epilogue
# ----------------------------------------------------------------------------
def _make_norm_kernel(apply_relu: bool, add_skip: bool, split_col):
    """split_col=None -> skip (if any) spans full width; else skip covers lanes [0, split_col)."""
    def kernel(*refs):
        if add_skip:
            y_ref, scale_ref, shift_ref, skip_ref, o_ref = refs
        else:
            y_ref, scale_ref, shift_ref, o_ref = refs
        out = y_ref[...].astype(jnp.float32) * scale_ref[...] + shift_ref[...]
        if add_skip and split_col is not None:
            # Option-A shortcut: real skip channels live in the first split_col lanes;
            # the remaining lanes implicitly receive zeros (no full-width skip in HBM).
            lo = out[:, :split_col] + skip_ref[...]
            hi = out[:, split_col:]
            if apply_relu:
                lo = jnp.maximum(lo, 0.0)
                hi = jnp.maximum(hi, 0.0)
            o_ref[:, :split_col] = lo.astype(o_ref.dtype)
            o_ref[:, split_col:] = hi.astype(o_ref.dtype)
            return
        if add_skip:
            out = out + skip_ref[...]
        if apply_relu:
            out = jnp.maximum(out, 0.0)
        o_ref[...] = out.astype(o_ref.dtype)
    return kernel


def _fused_conv_bn(patches, w2d, gamma, beta, skip=None, apply_relu=True,
                   out_dtype=jnp.float32):
    """conv (matmul over im2col patches) + training-mode BN (+ skip) (+ ReLU).

    patches: (M, K) bf16/f32, w2d: (K, Cout), gamma/beta: (Cout,),
    skip: (M, Cs) with Cs <= Cout (missing channels == option-A zero padding).
    Returns (M, Cout) in `out_dtype`.
    """
    M, K = patches.shape
    Cout = w2d.shape[1]
    max_tile_m, vmem_limit = _tile_config()

    # Balanced row tiles: padding bounded to < one sublane group per tile.
    n_tiles = -(-M // max_tile_m)
    tile_m = _round_up(-(-M // n_tiles), 16)
    m_pad = tile_m * n_tiles
    k_pad = _round_up(K, LANE)
    c_pad = _round_up(Cout, LANE)

    # Zero-pad to lane/sublane-friendly shapes (exact: zero rows/cols contribute 0).
    p_bf16 = jnp.pad(patches.astype(jnp.bfloat16), ((0, m_pad - M), (0, k_pad - K)))
    w_bf16 = jnp.pad(w2d.astype(jnp.bfloat16), ((0, k_pad - K), (0, c_pad - Cout)))

    # ---- pass 1: matmul + packed per-tile stats (M axis fully parallel) ----
    conv_out, stats = pl.pallas_call(
        _conv_stats_kernel,
        grid=(n_tiles,),
        in_specs=(
            pl.BlockSpec((tile_m, k_pad), lambda i: (i, 0)),
            pl.BlockSpec((k_pad, c_pad), lambda i: (0, 0)),   # constant index -> resident
        ),
        out_specs=(
            pl.BlockSpec((tile_m, c_pad), lambda i: (i, 0)),
            pl.BlockSpec((16, c_pad), lambda i: (i, 0)),
        ),
        out_shape=(
            jax.ShapeDtypeStruct((m_pad, c_pad), jnp.bfloat16),
            jax.ShapeDtypeStruct((n_tiles * 16, c_pad), jnp.float32),
        ),
        compiler_params=pltpu.CompilerParams(
            dimension_semantics=("parallel",),
            vmem_limit_bytes=vmem_limit),
        cost_estimate=pl.CostEstimate(
            flops=2 * m_pad * k_pad * c_pad,
            transcendentals=0,
            bytes_accessed=(m_pad * k_pad * 2 + k_pad * c_pad * 2
                            + m_pad * c_pad * 2 + n_tiles * 16 * c_pad * 4)),
    )(p_bf16, w_bf16)

    # ---- tiny per-channel finalize: Welford-style combine, fold BN into scale/shift ----
    stats = stats.reshape(n_tiles, 16, c_pad)
    tile_sum = stats[:, 0, :]                       # rows within a half-block are identical
    tile_ssq = stats[:, 8, :]
    counts = jnp.clip(M - jnp.arange(n_tiles) * tile_m, 0, tile_m)
    counts = counts.astype(jnp.float32).reshape(n_tiles, 1)   # true (unpadded) rows per tile
    safe = jnp.maximum(counts, 1.0)
    mean_t = tile_sum / safe
    m2_t = tile_ssq - tile_sum * mean_t                       # per-tile sum of squared devs
    mean = jnp.sum(tile_sum, axis=0) / float(M)
    m2 = jnp.sum(m2_t, axis=0) + jnp.sum(counts * (mean_t - mean) ** 2, axis=0)
    var = jnp.maximum(m2 / float(M), 0.0)                     # biased variance (BN training)
    gamma_p = jnp.pad(gamma.astype(jnp.float32), (0, c_pad - Cout))
    beta_p = jnp.pad(beta.astype(jnp.float32), (0, c_pad - Cout))
    scale_c = gamma_p * jax.lax.rsqrt(var + EPS)
    shift_c = beta_p - mean * scale_c
    scale = scale_c.reshape(1, c_pad)
    shift = shift_c.reshape(1, c_pad)

    # ---- pass 2: normalize + residual + ReLU ----
    add_skip = skip is not None
    inputs = [conv_out, scale, shift]
    in_specs = [
        pl.BlockSpec((tile_m, c_pad), lambda i: (i, 0)),
        pl.BlockSpec((1, c_pad), lambda i: (0, 0)),
        pl.BlockSpec((1, c_pad), lambda i: (0, 0)),
    ]
    split_col = None
    skip_bytes = 0
    if add_skip:
        cs = skip.shape[1]
        cs_pad = _round_up(cs, LANE)
        # Pad the skip only to cs_pad (NOT to c_pad); remaining lanes are supplied
        # as implicit zeros inside the kernel.
        skip_p = jnp.pad(skip.astype(jnp.float32),
                         ((0, m_pad - M), (0, cs_pad - cs)))
        inputs.append(skip_p)
        in_specs.append(pl.BlockSpec((tile_m, cs_pad), lambda i: (i, 0)))
        split_col = None if cs_pad == c_pad else cs_pad
        skip_bytes = m_pad * cs_pad * 4

    out = pl.pallas_call(
        _make_norm_kernel(apply_relu=apply_relu, add_skip=add_skip, split_col=split_col),
        grid=(n_tiles,),
        in_specs=in_specs,
        out_specs=pl.BlockSpec((tile_m, c_pad), lambda i: (i, 0)),
        out_shape=jax.ShapeDtypeStruct((m_pad, c_pad), out_dtype),
        compiler_params=pltpu.CompilerParams(
            dimension_semantics=("parallel",),
            vmem_limit_bytes=vmem_limit),
        cost_estimate=pl.CostEstimate(
            flops=4 * m_pad * c_pad,
            transcendentals=0,
            bytes_accessed=(m_pad * c_pad * (2 + jnp.dtype(out_dtype).itemsize)
                            + skip_bytes + 2 * c_pad * 4)),
    )(*inputs)

    # No-op (elided by XLA) when M/Cout are already lane/tile aligned; needed otherwise
    # because padded rows cannot feed the next stage's spatial reshape.
    return out[:M, :Cout]


# ----------------------------------------------------------------------------
# Glue: im2col patch extraction (layout plumbing) and the Block forward pass
# ----------------------------------------------------------------------------
def _im2col(x_nhwc, stride):
    """3x3, padding=1 patch extraction. Returns (N*Hout*Wout, 9*Cin) and dims."""
    N, H, W, Cin = x_nhwc.shape
    xp = jnp.pad(x_nhwc, ((0, 0), (1, 1), (1, 1), (0, 0)))
    Hout = (H + 2 - 3) // stride + 1
    Wout = (W + 2 - 3) // stride + 1
    cols = []
    for kh in range(3):
        for kw in range(3):
            cols.append(
                xp[:, kh:kh + (Hout - 1) * stride + 1:stride,
                      kw:kw + (Wout - 1) * stride + 1:stride, :])
    patches = jnp.stack(cols, axis=3)                  # (N, Hout, Wout, 9, Cin)
    return patches.reshape(N * Hout * Wout, 9 * Cin), (N, Hout, Wout)


def block_forward(x_nchw, params, stride, skip_connections=False):
    """Equivalent of Block.forward(X, skip_connections) (training-mode BN)."""
    x = jnp.transpose(x_nchw, (0, 2, 3, 1))            # NCHW -> NHWC
    N, H, W, Cin = x.shape
    w1, g1, b1 = params["w1"], params["g1"], params["b1"]
    w2, g2, b2 = params["w2"], params["g2"], params["b2"]
    Cout = w1.shape[-1]

    # --- stage 1: conv1(stride) + bn1 + relu1 --- (bf16 patches; bf16 stage output)
    p1, (n1, h1o, w1o) = _im2col(x.astype(jnp.bfloat16), stride)
    h1 = _fused_conv_bn(p1, w1.reshape(9 * Cin, Cout), g1, b1,
                        apply_relu=True, out_dtype=jnp.bfloat16)
    h1 = h1.reshape(n1, h1o, w1o, Cout)

    # --- stage 2: conv2(stride=1) + bn2 (+ skip) + relu2 ---
    p2, (n2, h2o, w2o) = _im2col(h1, 1)                # already bf16: no extra cast pass
    skip = None
    if skip_connections:
        if x.shape == (n2, h2o, w2o, Cout):
            skip = x.reshape(n2 * h2o * w2o, Cout)     # identity shortcut
        else:
            # AvgPool2d(kernel=1, stride=2) == strided subsample; option-A channel zeros
            # are supplied inside the kernel (only the real Cin channels go to HBM).
            xs = x[:, ::2, ::2, :]
            skip = xs.reshape(n2 * h2o * w2o, Cin)
    out = _fused_conv_bn(p2, w2.reshape(9 * Cout, Cout), g2, b2,
                         skip=skip, apply_relu=True, out_dtype=jnp.float32)
    out = out.reshape(n2, h2o, w2o, Cout)
    return jnp.transpose(out, (0, 3, 1, 2))            # NHWC -> NCHW


# ----------------------------------------------------------------------------
# Pure-JAX (f32) reference for the correctness check
# ----------------------------------------------------------------------------
def reference_forward(x_nchw, params, stride, skip_connections=False):
    x = jnp.transpose(x_nchw, (0, 2, 3, 1))
    w1, g1, b1 = params["w1"], params["g1"], params["b1"]
    w2, g2, b2 = params["w2"], params["g2"], params["b2"]

    def conv(x, w, s):
        return jax.lax.conv_general_dilated(
            x, w, (s, s), ((1, 1), (1, 1)),
            dimension_numbers=("NHWC", "HWIO", "NHWC"))

    def bn(y, g, b):
        m = jnp.mean(y, axis=(0, 1, 2), keepdims=True)
        v = jnp.mean((y - m) ** 2, axis=(0, 1, 2), keepdims=True)
        return (y - m) * jax.lax.rsqrt(v + EPS) * g + b

    h = jnp.maximum(bn(conv(x, w1, stride), g1, b1), 0.0)
    out = bn(conv(h, w2, 1), g2, b2)
    if skip_connections:
        if out.shape == x.shape:
            out = out + x
        else:
            xs = x[:, ::2, ::2, :]
            out = out + jnp.concatenate([xs, jnp.zeros_like(xs)], axis=-1)
    out = jnp.maximum(out, 0.0)
    return jnp.transpose(out, (0, 3, 1, 2))


# ----------------------------------------------------------------------------
if __name__ == "__main__":
    key = jax.random.PRNGKey(0)
    N, Cin, H, W = 2, 4, 16, 16          # small NCHW input
    stride = 2                           # exercises downsample + option-A zero-pad skip
    Cout = Cin * stride                  # conv1: out_channels // stride -> out_channels

    kx, kw1, kw2 = jax.random.split(key, 3)
    x = jax.random.normal(kx, (N, Cin, H, W), jnp.float32)

    # Kaiming-normal (fan_out, relu): std = sqrt(2 / (Cout*3*3)); weights in HWIO layout
    std = math.sqrt(2.0 / (Cout * 3 * 3))
    params = {
        "w1": jax.random.normal(kw1, (3, 3, Cin, Cout), jnp.float32) * std,
        "g1": jnp.ones((Cout,), jnp.float32),
        "b1": jnp.zeros((Cout,), jnp.float32),
        "w2": jax.random.normal(kw2, (3, 3, Cout, Cout), jnp.float32) * std,
        "g2": jnp.ones((Cout,), jnp.float32),
        "b2": jnp.zeros((Cout,), jnp.float32),
    }

    fwd = jax.jit(lambda xx, pp: block_forward(xx, pp, stride, True))
    out = jax.block_until_ready(fwd(x, params))
    ref = jax.block_until_ready(
        reference_forward(x, params, stride, skip_connections=True))

    assert out.shape == (N, Cout, H // stride, W // stride), out.shape
    # Tolerance reflects bf16 MXU inputs AND bf16 intermediate activations
    # (f32 accumulation / stats) vs the all-f32 reference.
    err = float(jnp.max(jnp.abs(out - ref)))
    assert jnp.allclose(out, ref, atol=5e-2, rtol=5e-2), err

    print("KERNEL_OK")
</pallas_src>

<mosaic_0001>
module attributes {stable_mosaic.version = 11 : i64} {
  func.func @kernel(%arg0: i32, %arg1: memref<128x128xbf16, #tpu.memory_space<vmem>>, %arg2: memref<1x128xf32, #tpu.memory_space<vmem>>, %arg3: memref<1x128xf32, #tpu.memory_space<vmem>>, %arg4: memref<128x128xbf16, #tpu.memory_space<vmem>>) attributes {dimension_semantics = [#tpu.dimension_semantics<parallel>], iteration_bounds = array<i64: 1>, scalar_prefetch = 0 : i64, scratch_operands = 0 : i64, tpu.core_type = #tpu.core_type<tc>, window_params = [{transform_indices = @transform_0, window_bounds = array<i64: 128, 128>}, {pipeline_mode = #tpu.pipeline_mode<synchronous>, transform_indices = @transform_1, window_bounds = array<i64: 1, 128>}, {pipeline_mode = #tpu.pipeline_mode<synchronous>, transform_indices = @transform_2, window_bounds = array<i64: 1, 128>}, {transform_indices = @transform_3, window_bounds = array<i64: 128, 128>}]} {
    %c0 = arith.constant 0 : index
    %c0_0 = arith.constant 0 : index
    %0 = vector.load %arg1[%c0, %c0_0] : memref<128x128xbf16, #tpu.memory_space<vmem>>, vector<128x128xbf16>
    %1 = arith.extf %0 : vector<128x128xbf16> to vector<128x128xf32>
    %c0_1 = arith.constant 0 : index
    %c0_2 = arith.constant 0 : index
    %2 = vector.load %arg2[%c0_1, %c0_2] : memref<1x128xf32, #tpu.memory_space<vmem>>, vector<1x128xf32>
    %3 = vector.broadcast %2 : vector<1x128xf32> to vector<128x128xf32>
    %4 = arith.mulf %1, %3 : vector<128x128xf32>
    %c0_3 = arith.constant 0 : index
    %c0_4 = arith.constant 0 : index
    %5 = vector.load %arg3[%c0_3, %c0_4] : memref<1x128xf32, #tpu.memory_space<vmem>>, vector<1x128xf32>
    %6 = vector.broadcast %5 : vector<1x128xf32> to vector<128x128xf32>
    %7 = arith.addf %4, %6 : vector<128x128xf32>
    %cst = arith.constant 0.000000e+00 : f32
    %8 = vector.broadcast %cst : f32 to vector<128x128xf32>
    %9 = arith.maximumf %7, %8 : vector<128x128xf32>
    %10 = arith.truncf %9 : vector<128x128xf32> to vector<128x128xbf16>
    %c0_5 = arith.constant 0 : index
    %c0_6 = arith.constant 0 : index
    %11 = vector.load %arg4[%c0_5, %c0_6] : memref<128x128xbf16, #tpu.memory_space<vmem>>, vector<128x128xbf16>
    tpu.vector_store %arg4[%c0_5, %c0_6], %10 {strides = array<i32>} : memref<128x128xbf16, #tpu.memory_space<vmem>>, vector<128x128xbf16>,
    return
  }
  func.func @transform_0(%arg0: i32) -> (i32, i32) {
    %c0_i32 = arith.constant 0 : i32
    %c0_i32_0 = arith.constant 0 : i32
    return %arg0, %c0_i32 : i32, i32
  }
  func.func @transform_1(%arg0: i32) -> (i32, i32) {
    %c0_i32 = arith.constant 0 : i32
    %c0_i32_0 = arith.constant 0 : i32
    %c0_i32_1 = arith.constant 0 : i32
    return %c0_i32, %c0_i32_0 : i32, i32
  }
  func.func @transform_2(%arg0: i32) -> (i32, i32) {
    %c0_i32 = arith.constant 0 : i32
    %c0_i32_0 = arith.constant 0 : i32
    %c0_i32_1 = arith.constant 0 : i32
    return %c0_i32, %c0_i32_0 : i32, i32
  }
  func.func @transform_3(%arg0: i32) -> (i32, i32) {
    %c0_i32 = arith.constant 0 : i32
    %c0_i32_0 = arith.constant 0 : i32
    return %arg0, %c0_i32 : i32, i32
  }
}

module attributes {stable_mosaic.version = 11 : i64} {
  func.func @_conv_stats_kernel(%arg0: i32, %arg1: memref<128x128xbf16, #tpu.memory_space<vmem>>, %arg2: memref<128x128xbf16, #tpu.memory_space<vmem>>, %arg3: memref<128x128xbf16, #tpu.memory_space<vmem>>, %arg4: memref<16x128xf32, #tpu.memory_space<vmem>>) attributes {dimension_semantics = [#tpu.dimension_semantics<parallel>], iteration_bounds = array<i64: 1>, scalar_prefetch = 0 : i64, scratch_operands = 0 : i64, tpu.core_type = #tpu.core_type<tc>, window_params = [{transform_indices = @transform_0, window_bounds = array<i64: 128, 128>}, {pipeline_mode = #tpu.pipeline_mode<synchronous>, transform_indices = @transform_1, window_bounds = array<i64: 128, 128>}, {transform_indices = @transform_2, window_bounds = array<i64: 128, 128>}, {transform_indices = @transform_3, window_bounds = array<i64: 16, 128>}]} {
    %c0 = arith.constant 0 : index
    %c0_0 = arith.constant 0 : index
    %0 = vector.load %arg1[%c0, %c0_0] : memref<128x128xbf16, #tpu.memory_space<vmem>>, vector<128x128xbf16>
    %c0_1 = arith.constant 0 : index
    %c0_2 = arith.constant 0 : index
    %1 = vector.load %arg2[%c0_1, %c0_2] : memref<128x128xbf16, #tpu.memory_space<vmem>>, vector<128x128xbf16>
    %cst = arith.constant dense<0.000000e+00> : vector<128x128xf32>
    %2 = tpu.matmul %0, %1, %cst {dimension_numbers = #tpu.dot_dimension_numbers<[1], [0], [0], [1], [0, 0, 1, 1], [], []>} : vector<128x128xbf16>, vector<128x128xbf16>, vector<128x128xf32> -> vector<128x128xf32>
    %3 = arith.truncf %2 : vector<128x128xf32> to vector<128x128xbf16>
    %c0_3 = arith.constant 0 : index
    %c0_4 = arith.constant 0 : index
    %4 = vector.load %arg3[%c0_3, %c0_4] : memref<128x128xbf16, #tpu.memory_space<vmem>>, vector<128x128xbf16>
    tpu.vector_store %arg3[%c0_3, %c0_4], %3 {strides = array<i32>} : memref<128x128xbf16, #tpu.memory_space<vmem>>, vector<128x128xbf16>,
    %cst_5 = arith.constant dense<0.000000e+00> : vector<128xf32>
    %5 = vector.multi_reduction <add>, %2, %cst_5 [0] : vector<128x128xf32> to vector<128xf32>
    %6 = vector.shape_cast %5 : vector<128xf32> to vector<1x128xf32>
    %7 = arith.mulf %2, %2 : vector<128x128xf32>
    %cst_6 = arith.constant dense<0.000000e+00> : vector<128xf32>
    %8 = vector.multi_reduction <add>, %7, %cst_6 [0] : vector<128x128xf32> to vector<128xf32>
    %9 = vector.shape_cast %8 : vector<128xf32> to vector<1x128xf32>
    %10 = vector.shape_cast %6 : vector<1x128xf32> to vector<1x128xf32>
    %11 = vector.broadcast %10 : vector<1x128xf32> to vector<8x128xf32>
    %12 = vector.shape_cast %9 : vector<1x128xf32> to vector<1x128xf32>
    %13 = vector.broadcast %12 : vector<1x128xf32> to vector<8x128xf32>
    %14 = tpu.concatenate %11, %13 in 0 : vector<8x128xf32>, vector<8x128xf32> -> vector<16x128xf32>
    %c0_7 = arith.constant 0 : index
    %c0_8 = arith.constant 0 : index
    %15 = vector.load %arg4[%c0_7, %c0_8] : memref<16x128xf32, #tpu.memory_space<vmem>>, vector<16x128xf32>
    tpu.vector_store %arg4[%c0_7, %c0_8], %14 {strides = array<i32>} : memref<16x128xf32, #tpu.memory_space<vmem>>, vector<16x128xf32>,
    return
  }
  func.func @transform_0(%arg0: i32) -> (i32, i32) {
    %c0_i32 = arith.constant 0 : i32
    %c0_i32_0 = arith.constant 0 : i32
    return %arg0, %c0_i32 : i32, i32
  }
  func.func @transform_1(%arg0: i32) -> (i32, i32) {
    %c0_i32 = arith.constant 0 : i32
    %c0_i32_0 = arith.constant 0 : i32
    %c0_i32_1 = arith.constant 0 : i32
    return %c0_i32, %c0_i32_0 : i32, i32
  }
  func.func @transform_2(%arg0: i32) -> (i32, i32) {
    %c0_i32 = arith.constant 0 : i32
    %c0_i32_0 = arith.constant 0 : i32
    return %arg0, %c0_i32 : i32, i32
  }
  func.func @transform_3(%arg0: i32) -> (i32, i32) {
    %c0_i32 = arith.constant 0 : i32
    %c0_i32_0 = arith.constant 0 : i32
    return %arg0, %c0_i32 : i32, i32
  }
}

module attributes {stable_mosaic.version = 11 : i64} {
  func.func @kernel(%arg0: i32, %arg1: memref<128x128xbf16, #tpu.memory_space<vmem>>, %arg2: memref<1x128xf32, #tpu.memory_space<vmem>>, %arg3: memref<1x128xf32, #tpu.memory_space<vmem>>, %arg4: memref<128x128xf32, #tpu.memory_space<vmem>>, %arg5: memref<128x128xf32, #tpu.memory_space<vmem>>) attributes {dimension_semantics = [#tpu.dimension_semantics<parallel>], iteration_bounds = array<i64: 1>, scalar_prefetch = 0 : i64, scratch_operands = 0 : i64, tpu.core_type = #tpu.core_type<tc>, window_params = [{transform_indices = @transform_0, window_bounds = array<i64: 128, 128>}, {pipeline_mode = #tpu.pipeline_mode<synchronous>, transform_indices = @transform_1, window_bounds = array<i64: 1, 128>}, {pipeline_mode = #tpu.pipeline_mode<synchronous>, transform_indices = @transform_2, window_bounds = array<i64: 1, 128>}, {transform_indices = @transform_3, window_bounds = array<i64: 128, 128>}, {transform_indices = @transform_4, window_bounds = array<i64: 128, 128>}]} {
    %c0 = arith.constant 0 : index
    %c0_0 = arith.constant 0 : index
    %0 = vector.load %arg1[%c0, %c0_0] : memref<128x128xbf16, #tpu.memory_space<vmem>>, vector<128x128xbf16>
    %1 = arith.extf %0 : vector<128x128xbf16> to vector<128x128xf32>
    %c0_1 = arith.constant 0 : index
    %c0_2 = arith.constant 0 : index
    %2 = vector.load %arg2[%c0_1, %c0_2] : memref<1x128xf32, #tpu.memory_space<vmem>>, vector<1x128xf32>
    %3 = vector.broadcast %2 : vector<1x128xf32> to vector<128x128xf32>
    %4 = arith.mulf %1, %3 : vector<128x128xf32>
    %c0_3 = arith.constant 0 : index
    %c0_4 = arith.constant 0 : index
    %5 = vector.load %arg3[%c0_3, %c0_4] : memref<1x128xf32, #tpu.memory_space<vmem>>, vector<1x128xf32>
    %6 = vector.broadcast %5 : vector<1x128xf32> to vector<128x128xf32>
    %7 = arith.addf %4, %6 : vector<128x128xf32>
    %c0_5 = arith.constant 0 : index
    %c0_6 = arith.constant 0 : index
    %8 = vector.load %arg4[%c0_5, %c0_6] : memref<128x128xf32, #tpu.memory_space<vmem>>, vector<128x128xf32>
    %9 = arith.addf %7, %8 : vector<128x128xf32>
    %cst = arith.constant 0.000000e+00 : f32
    %10 = vector.broadcast %cst : f32 to vector<128x128xf32>
    %11 = arith.maximumf %9, %10 : vector<128x128xf32>
    %c0_7 = arith.constant 0 : index
    %c0_8 = arith.constant 0 : index
    %12 = vector.load %arg5[%c0_7, %c0_8] : memref<128x128xf32, #tpu.memory_space<vmem>>, vector<128x128xf32>
    tpu.vector_store %arg5[%c0_7, %c0_8], %11 {strides = array<i32>} : memref<128x128xf32, #tpu.memory_space<vmem>>, vector<128x128xf32>,
    return
  }
  func.func @transform_0(%arg0: i32) -> (i32, i32) {
    %c0_i32 = arith.constant 0 : i32
    %c0_i32_0 = arith.constant 0 : i32
    return %arg0, %c0_i32 : i32, i32
  }
  func.func @transform_1(%arg0: i32) -> (i32, i32) {
    %c0_i32 = arith.constant 0 : i32
    %c0_i32_0 = arith.constant 0 : i32
    %c0_i32_1 = arith.constant 0 : i32
    return %c0_i32, %c0_i32_0 : i32, i32
  }
  func.func @transform_2(%arg0: i32) -> (i32, i32) {
    %c0_i32 = arith.constant 0 : i32
    %c0_i32_0 = arith.constant 0 : i32
    %c0_i32_1 = arith.constant 0 : i32
    return %c0_i32, %c0_i32_0 : i32, i32
  }
  func.func @transform_3(%arg0: i32) -> (i32, i32) {
    %c0_i32 = arith.constant 0 : i32
    %c0_i32_0 = arith.constant 0 : i32
    return %arg0, %c0_i32 : i32, i32
  }
  func.func @transform_4(%arg0: i32) -> (i32, i32) {
    %c0_i32 = arith.constant 0 : i32
    %c0_i32_0 = arith.constant 0 : i32
    return %arg0, %c0_i32 : i32, i32
  }
}

</mosaic_0001>

<bundles_post_ra>
// kernel: _lambda_.5
= control target key start
LH: loop header
LB: loop body
LE: loop exit
PB: predicated region body
PF: predicated region fallthrough
CT: control target
= control target key end

     0   :  { %s422_s0 = inlined_call_operand.vmem [shape: bf16[128,128], index: 0, kind: input, shape index: {}]   ;;  %s423_s1 = inlined_call_operand.vmem [shape: f32[1,128], index: 1, kind: input, shape index: {}]   ;;  %s424_s2 = inlined_call_operand.vmem [shape: f32[1,128], index: 2, kind: input, shape index: {}]   ;;  %s425_s3 = inlined_call_operand.vmem [shape: bf16[128,128], index: 3, kind: output, shape index: {}]  }
   0x1   :  { %v227_v0 = vld [vmem:[%s422_s0] sm:$0xff]   ;;  %v298_v4 = vld [vmem:[%s422_s0 + $0x8] sm:$0xff]   ;;  %v299_v5 = vld [vmem:[%s422_s0 + $0x10] sm:$0xff]  }
   0x2   :  { %v338_v1 = vld [vmem:[%s423_s1] ss:$0 sm:$0xff]  ;;  %v228_v2 = vunpack.c.l.bf16 %v227_v0  ;;  %v229_v3 = vunpack.c.h.bf16 %v227_v0  ;;  %v300_v6 = vld [vmem:[%s422_s0 + $0x18] sm:$0xff]   ;;  %v232_v8 = vunpack.c.l.bf16 %v298_v4  ;;  %v233_v9 = vunpack.c.h.bf16 %v298_v4  ;;  %v302_v33 = vld [vmem:[%s422_s0 + $0x28] sm:$0xff]  }
   0x3   :  { %v352_v7 = vld [vmem:[%s424_s2] ss:$0 sm:$0xff]  ;;  %v236_v10 = vunpack.c.l.bf16 %v299_v5  ;;  %v237_v11 = vunpack.c.h.bf16 %v299_v5  ;;  %v240_v14 = vunpack.c.l.bf16 %v300_v6  ;;  %v241_v15 = vunpack.c.h.bf16 %v300_v6  ;;  %v303_v38 = vld [vmem:[%s422_s0 + $0x30] sm:$0xff]   ;;  %v304_v43 = vld [vmem:[%s422_s0 + $0x38] sm:$0xff]  }
   0x4   :  { %v53_v12 = vmul.f32 %v228_v2, %v338_v1  ;;  %v54_v13 = vmul.f32 %v229_v3, %v338_v1  ;;  %v55_v16 = vmul.f32 %v232_v8, %v338_v1  ;;  %v56_v17 = vmul.f32 %v233_v9, %v338_v1  ;;  %v301_v28 = vld [vmem:[%s422_s0 + $0x20] sm:$0xff]  }
   0x5   :  { %v57_v18 = vmul.f32 %v236_v10, %v338_v1  ;;  %v58_v19 = vmul.f32 %v237_v11, %v338_v1  ;;  %v59_v22 = vmul.f32 %v240_v14, %v338_v1  ;;  %v60_v23 = vmul.f32 %v241_v15, %v338_v1 }
   0x6   :  { %v76_v20 = vadd.f32 %v352_v7, %v53_v12  ;;  %v77_v21 = vadd.f32 %v352_v7, %v54_v13  ;;  %v78_v24 = vadd.f32 %v352_v7, %v55_v16  ;;  %v79_v25 = vadd.f32 %v352_v7, %v56_v17 }
   0x7   :  { %v80_v26 = vadd.f32 %v352_v7, %v57_v18  ;;  %v81_v27 = vadd.f32 %v352_v7, %v58_v19  ;;  %v82_v31 = vadd.f32 %v352_v7, %v59_v22  ;;  %v83_v32 = vadd.f32 %v352_v7, %v60_v23 }
   0x8   :  { %v92_v29 = vmax.f32 %v76_v20, 0.0  ;;  %v93_v30 = vmax.f32 %v77_v21, 0.0  ;;  %v94_v34 = vmax.f32 %v78_v24, 0.0  ;;  %v95_v35 = vmax.f32 %v79_v25, 0.0 }
   0x9   :  { %v96_v36 = vmax.f32 %v80_v26, 0.0  ;;  %v97_v37 = vmax.f32 %v81_v27, 0.0  ;;  %v98_v40 = vmax.f32 %v82_v31, 0.0  ;;  %v99_v41 = vmax.f32 %v83_v32, 0.0 }
   0xa   :  { %v261_v39 = vpack.c.bf16 %v93_v30, %v92_v29  ;;  %v244_v42 = vunpack.c.l.bf16 %v301_v28  ;;  %v266_v44 = vpack.c.bf16 %v95_v35, %v94_v34  ;;  %v245_v46 = vunpack.c.h.bf16 %v301_v28 }
   0xb   :  { %v271_v45 = vpack.c.bf16 %v97_v37, %v96_v36  ;;  %v248_v47 = vunpack.c.l.bf16 %v302_v33  ;;  %v276_v48 = vpack.c.bf16 %v99_v41, %v98_v40  ;;  %v249_v50 = vunpack.c.h.bf16 %v302_v33 }
   0xc   :  { %262 = vst [vmem:[%s425_s3] sm:$0xff] %v261_v39   ;;  %v61_v49 = vmul.f32 %v244_v42, %v338_v1  ;;  %v252_v51 = vunpack.c.l.bf16 %v303_v38  ;;  %305 = vst [vmem:[%s425_s3 + $0x8] sm:$0xff] %v266_v44   ;;  %v62_v52 = vmul.f32 %v245_v46, %v338_v1  ;;  %v253_v54 = vunpack.c.h.bf16 %v303_v38 }
   0xd   :  { %306 = vst [vmem:[%s425_s3 + $0x10] sm:$0xff] %v271_v45   ;;  %v63_v53 = vmul.f32 %v248_v47, %v338_v1  ;;  %v256_v55 = vunpack.c.l.bf16 %v304_v43  ;;  %307 = vst [vmem:[%s425_s3 + $0x18] sm:$0xff] %v276_v48   ;;  %v64_v57 = vmul.f32 %v249_v50, %v338_v1  ;;  %v257_v59 = vunpack.c.h.bf16 %v304_v43 }
   0xe   :  { %v84_v56 = vadd.f32 %v352_v7, %v61_v49  ;;  %v65_v58 = vmul.f32 %v252_v51, %v338_v1  ;;  %v85_v60 = vadd.f32 %v352_v7, %v62_v52  ;;  %v66_v62 = vmul.f32 %v253_v54, %v338_v1 }
   0xf   :  { %v86_v61 = vadd.f32 %v352_v7, %v63_v53  ;;  %v67_v63 = vmul.f32 %v256_v55, %v338_v1  ;;  %v87_v2 = vadd.f32 %v352_v7, %v64_v57  ;;  %v68_v4 = vmul.f32 %v257_v59, %v338_v1 }
  0x10   :  { %v100_v0 = vmax.f32 %v84_v56, 0.0  ;;  %v88_v3 = vadd.f32 %v352_v7, %v65_v58  ;;  %v101_v5 = vmax.f32 %v85_v60, 0.0  ;;  %v89_v8 = vadd.f32 %v352_v7, %v66_v62 }
  0x11   :  { %v102_v6 = vmax.f32 %v86_v61, 0.0  ;;  %v90_v9 = vadd.f32 %v352_v7, %v67_v63  ;;  %v103_v10 = vmax.f32 %v87_v2, 0.0  ;;  %v91_v12 = vadd.f32 %v352_v7, %v68_v4 }
  0x12   :  { %v104_v11 = vmax.f32 %v88_v3, 0.0  ;;  %v281_v13 = vpack.c.bf16 %v101_v5, %v100_v0  ;;  %v105_v14 = vmax.f32 %v89_v8, 0.0 }
  0x13   :  { %v106_v15 = vmax.f32 %v90_v9, 0.0  ;;  %v286_v16 = vpack.c.bf16 %v103_v10, %v102_v6  ;;  %v107_v17 = vmax.f32 %v91_v12, 0.0 }
  0x14   :  { %308 = vst [vmem:[%s425_s3 + $0x20] sm:$0xff] %v281_v13   ;;  %v291_v1 = vpack.c.bf16 %v105_v14, %v104_v11 }
  0x15   :  { %309 = vst [vmem:[%s425_s3 + $0x28] sm:$0xff] %v286_v16   ;;  %v296_v18 = vpack.c.bf16 %v107_v17, %v106_v15 }
  0x16   :  { %310 = vst [vmem:[%s425_s3 + $0x30] sm:$0xff] %v291_v1  }
  0x17   :  { %311 = vst [vmem:[%s425_s3 + $0x38] sm:$0xff] %v296_v18  }

// kernel: _lambda_.4
= control target key start
LH: loop header
LB: loop body
LE: loop exit
PB: predicated region body
PF: predicated region fallthrough
CT: control target
= control target key end

     0   :  { %s660_s1 = inlined_call_operand.vmem [shape: bf16[128,128], index: 1, kind: input, shape index: {}]   ;;  %s661_s0 = inlined_call_operand.vmem [shape: bf16[128,128], index: 0, kind: input, shape index: {}]   ;;  %s662_s2 = inlined_call_operand.vmem [shape: bf16[128,128], index: 2, kind: output, shape index: {0}]   ;;  %s663_s3 = inlined_call_operand.vmem [shape: f32[16,128], index: 3, kind: output, shape index: {1}]  }
   0x1   :  { %v546_v0 = vld [vmem:[%s660_s1] sm:$0xff]   ;;  %v547_v1 = vld [vmem:[%s660_s1 + $0x8] sm:$0xff]   ;;  %v548_v2 = vld [vmem:[%s660_s1 + $0x10] sm:$0xff]  }
   0x2   :  { %498 = vmatprep.subr.bf16.mxu0 %v546_v0  ;;  %530 = vmatprep.subr.bf16.mxu1 %v546_v0  ;;  %v549_v3 = vld [vmem:[%s660_s1 + $0x18] sm:$0xff]   ;;  %v554_v4 = vld [vmem:[%s661_s0] sm:$0xff]   ;;  %v551_v7 = vld [vmem:[%s660_s1 + $0x28] sm:$0xff]  }
   0x3   :  { %499 = vmatpush3.bf16.msra.mxu0 %v546_v0  ;;  %538 = vmatpush3.bf16.msra.mxu1 %v546_v0  ;;  %v550_v5 = vld [vmem:[%s660_s1 + $0x20] sm:$0xff]   ;;  %v552_v8 = vld [vmem:[%s660_s1 + $0x30] sm:$0xff]   ;;  %v553_v9 = vld [vmem:[%s660_s1 + $0x38] sm:$0xff]  }
   0x4   :  { %500 = vmatprep.subr.bf16.mxu0 %v547_v1  ;;  %531 = vmatprep.subr.bf16.mxu1 %v547_v1  ;;  %v558_v6 = vld [vmem:[%s661_s0 + $0x20] sm:$0xff]   ;;  %v555_v10 = vld [vmem:[%s661_s0 + $0x8] sm:$0xff]   ;;  %v556_v12 = vld [vmem:[%s661_s0 + $0x10] sm:$0xff]  }
   0x5   :  { %514 = vmatprep.mubr.bf16.mxu0 %v554_v4  ;;  %522 = vmatprep.mubr.bf16.mxu1 %v558_v6  ;;  %v559_v11 = vld [vmem:[%s661_s0 + $0x28] sm:$0xff]   ;;  %v560_v13 = vld [vmem:[%s661_s0 + $0x30] sm:$0xff]   ;;  %v557_v14 = vld [vmem:[%s661_s0 + $0x18] sm:$0xff]  }
   0x6   :  { %v561_v15 = vld [vmem:[%s661_s0 + $0x38] sm:$0xff]  }
   0x7   :  { %501 = vmatpush3.bf16.msra.mxu0 %v547_v1  ;;  %539 = vmatpush3.bf16.msra.mxu1 %v547_v1 }
   0x8   :  { %502 = vmatprep.subr.bf16.mxu0 %v548_v2  ;;  %532 = vmatprep.subr.bf16.mxu1 %v548_v2 }
   0xb   :  { %503 = vmatpush3.bf16.msra.mxu0 %v548_v2  ;;  %540 = vmatpush3.bf16.msra.mxu1 %v548_v2 }
   0xc   :  { %504 = vmatprep.subr.bf16.mxu0 %v549_v3  ;;  %533 = vmatprep.subr.bf16.mxu1 %v549_v3 }
   0xf   :  { %505 = vmatpush3.bf16.msra.mxu0 %v549_v3  ;;  %541 = vmatpush3.bf16.msra.mxu1 %v549_v3 }
  0x10   :  { %506 = vmatprep.subr.bf16.mxu0 %v550_v5  ;;  %534 = vmatprep.subr.bf16.mxu1 %v550_v5 }
  0x13   :  { %507 = vmatpush3.bf16.msra.mxu0 %v550_v5  ;;  %542 = vmatpush3.bf16.msra.mxu1 %v550_v5 }
  0x14   :  { %508 = vmatprep.subr.bf16.mxu0 %v551_v7  ;;  %535 = vmatprep.subr.bf16.mxu1 %v551_v7 }
  0x17   :  { %509 = vmatpush3.bf16.msra.mxu0 %v551_v7  ;;  %543 = vmatpush3.bf16.msra.mxu1 %v551_v7 }
  0x18   :  { %510 = vmatprep.subr.bf16.mxu0 %v552_v8  ;;  %536 = vmatprep.subr.bf16.mxu1 %v552_v8 }
  0x1b   :  { %511 = vmatpush3.bf16.msra.mxu0 %v552_v8  ;;  %544 = vmatpush3.bf16.msra.mxu1 %v552_v8 }
  0x1c   :  { %512 = vmatprep.subr.bf16.mxu0 %v553_v9  ;;  %537 = vmatprep.subr.bf16.mxu1 %v553_v9 }
  0x1f   :  { %513 = vmatpush3.bf16.msra.mxu0 %v553_v9  ;;  %545 = vmatpush3.bf16.msra.mxu1 %v553_v9 }
  0x22   :  { %515 = vmatmul.mubr.bf16.vlgmr.msra.gmra.mrb[0].mxu0 %v555_v10  ;;  %523 = vmatmul.mubr.bf16.vlgmr.msra.gmra.mrb[0].mxu1 %v559_v11 }
  0x23   :  { %518 = vmatprep.mubr.bf16.mxu0 %v556_v12  ;;  %526 = vmatprep.mubr.bf16.mxu1 %v560_v13 }
  0x2a   :  { %519 = vmatmul.mubr.bf16.gmra.mrb[4].mxu0 %v557_v14  ;;  %527 = vmatmul.mubr.bf16.gmra.mrb[4].mxu1 %v561_v15 }
  0xf5   :  { %v516_v16 = vpop.f32.mrb[0].mxu0  ;;  %v524_v17 = vpop.f32.mrb[0].mxu1 }
  0xf6   :  { %v176_v18 = vpop.f32.mrb[1].mxu0  ;;  %v208_v19 = vpop.f32.mrb[1].mxu1  ;;  %v342_v31 = vmul.f32 %v516_v16, %v516_v16  ;;  %v350_v3 = vmul.f32 %v524_v17, %v524_v17 }
  0xf7   :  { %v517_v20 = vpop.f32.mrb[2].mxu0  ;;  %v525_v21 = vpop.f32.mrb[2].mxu1  ;;  %v340_v22 = vmul.f32 %v176_v18, %v176_v18  ;;  %v348_v61 = vmul.f32 %v208_v19, %v208_v19 }
  0xf8   :  { %v443_v23 = vpack.c.bf16 %v517_v20, %v516_v16  ;;  %v179_v24 = vpop.f32.mrb[3].mxu0  ;;  %v463_v25 = vpack.c.bf16 %v525_v21, %v524_v17  ;;  %v211_v26 = vpop.f32.mrb[3].mxu1  ;;  %v343_v34 = vmul.f32 %v517_v20, %v517_v20  ;;  %v351_v6 = vmul.f32 %v525_v21, %v525_v21 }
  0xf9   :  { %v438_v27 = vpack.c.bf16 %v179_v24, %v176_v18  ;;  %v319_v28 = vadd.f32 %v179_v24, %v176_v18  ;;  %v341_v29 = vmul.f32 %v179_v24, %v179_v24  ;;  %v458_v30 = vpack.c.bf16 %v211_v26, %v208_v19 }
  0xfa   :  { %475 = vst [vmem:[%s662_s2 + $0x8] sm:$0xff] %v443_v23   ;;  %479 = vst [vmem:[%s662_s2 + $0x28] sm:$0xff] %v463_v25   ;;  %v349_v2 = vmul.f32 %v211_v26, %v211_v26 }
  0xfb   :  { %439 = vst [vmem:[%s662_s2] sm:$0xff] %v438_v27   ;;  %v320_v32 = vadd.f32 %v516_v16, %v319_v28  ;;  %v356_v33 = vadd.f32 %v341_v29, %v340_v22  ;;  %478 = vst [vmem:[%s662_s2 + $0x20] sm:$0xff] %v458_v30  }
  0xfd   :  { %v357_v35 = vadd.f32 %v356_v33, %v342_v31  ;;  %v520_v36 = vpop.f32.mrb[4].mxu0  ;;  %v321_v37 = vadd.f32 %v517_v20, %v320_v32  ;;  %v528_v38 = vpop.f32.mrb[4].mxu1 }
  0xfe   :  { %v192_v39 = vpop.f32.mrb[5].mxu0  ;;  %v224_v40 = vpop.f32.mrb[5].mxu1  ;;  %v346_v55 = vmul.f32 %v520_v36, %v520_v36  ;;  %v354_v15 = vmul.f32 %v528_v38, %v528_v38 }
  0xff   :  { %v322_v41 = vadd.f32 %v321_v37, %v192_v39  ;;  %v344_v42 = vmul.f32 %v192_v39, %v192_v39  ;;  %v358_v43 = vadd.f32 %v357_v35, %v343_v34  ;;  %v521_v44 = vpop.f32.mrb[6].mxu0  ;;  %v529_v45 = vpop.f32.mrb[6].mxu1  ;;  %v352_v9 = vmul.f32 %v224_v40, %v224_v40 }
 0x100   :  { %v453_v46 = vpack.c.bf16 %v521_v44, %v520_v36  ;;  %v195_v47 = vpop.f32.mrb[7].mxu0  ;;  %v473_v48 = vpack.c.bf16 %v529_v45, %v528_v38  ;;  %v227_v49 = vpop.f32.mrb[7].mxu1  ;;  %v347_v58 = vmul.f32 %v521_v44, %v521_v44 }
 0x101   :  { %v359_v50 = vadd.f32 %v358_v43, %v344_v42  ;;  %v448_v51 = vpack.c.bf16 %v195_v47, %v192_v39  ;;  %v323_v52 = vadd.f32 %v322_v41, %v195_v47  ;;  %v345_v53 = vmul.f32 %v195_v47, %v195_v47 }
 0x102   :  { %477 = vst [vmem:[%s662_s2 + $0x18] sm:$0xff] %v453_v46   ;;  %481 = vst [vmem:[%s662_s2 + $0x38] sm:$0xff] %v473_v48   ;;  %v468_v54 = vpack.c.bf16 %v227_v49, %v224_v40  ;;  %v353_v14 = vmul.f32 %v227_v49, %v227_v49 }
 0x103   :  { %476 = vst [vmem:[%s662_s2 + $0x10] sm:$0xff] %v448_v51   ;;  %v324_v56 = vadd.f32 %v520_v36, %v323_v52  ;;  %v360_v57 = vadd.f32 %v359_v50, %v345_v53 }
 0x104   :  { %480 = vst [vmem:[%s662_s2 + $0x30] sm:$0xff] %v468_v54  }
 0x105   :  { %v361_v59 = vadd.f32 %v360_v57, %v346_v55  ;;  %v325_v60 = vadd.f32 %v521_v44, %v324_v56 }
 0x107   :  { %v326_v62 = vadd.f32 %v325_v60, %v208_v19  ;;  %v362_v63 = vadd.f32 %v361_v59, %v347_v58  ;;  %v355_v19 = vmul.f32 %v529_v45, %v529_v45 }
 0x109   :  { %v363_v0 = vadd.f32 %v362_v63, %v348_v61  ;;  %v327_v1 = vadd.f32 %v326_v62, %v211_v26 }
 0x10b   :  { %v328_v4 = vadd.f32 %v524_v17, %v327_v1  ;;  %v364_v5 = vadd.f32 %v363_v0, %v349_v2 }
 0x10d   :  { %v365_v7 = vadd.f32 %v364_v5, %v350_v3  ;;  %v329_v8 = vadd.f32 %v525_v21, %v328_v4 }
 0x10f   :  { %v330_v10 = vadd.f32 %v329_v8, %v224_v40  ;;  %v366_v11 = vadd.f32 %v365_v7, %v351_v6 }
 0x111   :  { %v367_v12 = vadd.f32 %v366_v11, %v352_v9  ;;  %v331_v13 = vadd.f32 %v330_v10, %v227_v49 }
 0x113   :  { %v332_v16 = vadd.f32 %v528_v38, %v331_v13  ;;  %v368_v18 = vadd.f32 %v367_v12, %v353_v14 }
 0x115   :  { %v333_v20 = vadd.f32 %v529_v45, %v332_v16  ;;  %v369_v22 = vadd.f32 %v368_v18, %v354_v15 }
 0x117   :  { %v334_v23 = vrot.slane %v333_v20, 4  ;;  %v370_v24 = vadd.f32 %v369_v22, %v355_v19 }
 0x119   :  { %v335_v25 = vadd.f32 %v334_v23, %v333_v20  ;;  %v371_v17 = vrot.slane %v370_v24, 4 }
 0x11b   :  { %v336_v26 = vrot.slane %v335_v25, 2  ;;  %v372_v27 = vadd.f32 %v371_v17, %v370_v24 }
 0x11d   :  { %v337_v28 = vadd.f32 %v336_v26, %v335_v25  ;;  %v373_v21 = vrot.slane %v372_v27, 2 }
 0x11f   :  { %v338_v29 = vrot.slane %v337_v28, 1  ;;  %v374_v30 = vadd.f32 %v373_v21, %v372_v27 }
 0x121   :  { %v339_v31 = vadd.f32 %v338_v29, %v337_v28  ;;  %v375_v32 = vrot.slane %v374_v30, 1 }
 0x123   :  { %v376_v33 = vadd.f32 %v375_v32, %v374_v30  ;;  %377 = vst [vmem:[%s663_s3] sm:$0xff] %v339_v31 }
 0x125   :  { %378 = vst [vmem:[%s663_s3 + $0x8] sm:$0xff] %v376_v33 }

// kernel: _lambda_.7
= control target key start
LH: loop header
LB: loop body
LE: loop exit
PB: predicated region body
PF: predicated region fallthrough
CT: control target
= control target key end

     0   :  { %s391_s0 = inlined_call_operand.vmem [shape: bf16[128,128], index: 0, kind: input, shape index: {}]   ;;  %s392_s1 = inlined_call_operand.vmem [shape: f32[1,128], index: 1, kind: input, shape index: {}]   ;;  %s393_s2 = inlined_call_operand.vmem [shape: f32[1,128], index: 2, kind: input, shape index: {}]   ;;  %s394_s3 = inlined_call_operand.vmem [shape: f32[128,128], index: 3, kind: input, shape index: {}]   ;;  %s395_s4 = inlined_call_operand.vmem [shape: f32[128,128], index: 4, kind: output, shape index: {}]  }
   0x1   :  { %v166_v0 = vld [vmem:[%s391_s0] sm:$0xff]   ;;  %v197_v4 = vld [vmem:[%s391_s0 + $0x8] sm:$0xff]   ;;  %v198_v8 = vld [vmem:[%s391_s0 + $0x10] sm:$0xff]  }
   0x2   :  { %v235_v1 = vld [vmem:[%s392_s1] ss:$0 sm:$0xff]  ;;  %v167_v2 = vunpack.c.l.bf16 %v166_v0  ;;  %v168_v3 = vunpack.c.h.bf16 %v166_v0  ;;  %v171_v6 = vunpack.c.l.bf16 %v197_v4  ;;  %v172_v7 = vunpack.c.h.bf16 %v197_v4  ;;  %v199_v13 = vld [vmem:[%s391_s0 + $0x18] sm:$0xff]   ;;  %v96_v15 = vld [vmem:[%s394_s3 + $0x8] sm:$0xff] }
   0x3   :  { %v243_v5 = vld [vmem:[%s393_s2] ss:$0 sm:$0xff]  ;;  %v175_v11 = vunpack.c.l.bf16 %v198_v8  ;;  %v176_v12 = vunpack.c.h.bf16 %v198_v8  ;;  %v179_v18 = vunpack.c.l.bf16 %v199_v13  ;;  %v180_v19 = vunpack.c.h.bf16 %v199_v13  ;;  %v97_v22 = vld [vmem:[%s394_s3 + $0x10] sm:$0xff]  ;;  %v98_v23 = vld [vmem:[%s394_s3 + $0x18] sm:$0xff] }
   0x4   :  { %v56_v9 = vmul.f32 %v167_v2, %v235_v1  ;;  %v57_v10 = vmul.f32 %v168_v3, %v235_v1  ;;  %v95_v14 = vld [vmem:[%s394_s3] sm:$0xff]  ;;  %v58_v16 = vmul.f32 %v171_v6, %v235_v1  ;;  %v59_v17 = vmul.f32 %v172_v7, %v235_v1  ;;  %v100_v29 = vld [vmem:[%s394_s3 + $0x28] sm:$0xff]  ;;  %v101_v36 = vld [vmem:[%s394_s3 + $0x30] sm:$0xff] }
   0x5   :  { %v60_v24 = vmul.f32 %v175_v11, %v235_v1  ;;  %v61_v25 = vmul.f32 %v176_v12, %v235_v1  ;;  %v99_v28 = vld [vmem:[%s394_s3 + $0x20] sm:$0xff]  ;;  %v62_v30 = vmul.f32 %v179_v18, %v235_v1  ;;  %v63_v31 = vmul.f32 %v180_v19, %v235_v1  ;;  %v102_v37 = vld [vmem:[%s394_s3 + $0x38] sm:$0xff]  ;;  %v201_v47 = vld [vmem:[%s391_s0 + $0x28] sm:$0xff]  }
   0x6   :  { %v79_v20 = vadd.f32 %v243_v5, %v56_v9  ;;  %v80_v21 = vadd.f32 %v243_v5, %v57_v10  ;;  %v81_v26 = vadd.f32 %v243_v5, %v58_v16  ;;  %v82_v27 = vadd.f32 %v243_v5, %v59_v17  ;;  %v200_v42 = vld [vmem:[%s391_s0 + $0x20] sm:$0xff]   ;;  %v202_v52 = vld [vmem:[%s391_s0 + $0x30] sm:$0xff]   ;;  %v203_v57 = vld [vmem:[%s391_s0 + $0x38] sm:$0xff]  }
   0x7   :  { %v83_v34 = vadd.f32 %v243_v5, %v60_v24  ;;  %v84_v35 = vadd.f32 %v243_v5, %v61_v25  ;;  %v85_v40 = vadd.f32 %v243_v5, %v62_v30  ;;  %v86_v41 = vadd.f32 %v243_v5, %v63_v31  ;;  %v103_v3 = vld [vmem:[%s394_s3 + $0x40] sm:$0xff]  ;;  %v104_v4 = vld [vmem:[%s394_s3 + $0x48] sm:$0xff]  ;;  %v105_v12 = vld [vmem:[%s394_s3 + $0x50] sm:$0xff] }
   0x8   :  { %v111_v32 = vadd.f32 %v95_v14, %v79_v20  ;;  %v112_v33 = vadd.f32 %v96_v15, %v80_v21  ;;  %v113_v38 = vadd.f32 %v97_v22, %v81_v26  ;;  %v114_v39 = vadd.f32 %v98_v23, %v82_v27  ;;  %v106_v13 = vld [vmem:[%s394_s3 + $0x58] sm:$0xff]  ;;  %v107_v18 = vld [vmem:[%s394_s3 + $0x60] sm:$0xff]  ;;  %v108_v19 = vld [vmem:[%s394_s3 + $0x68] sm:$0xff] }
   0x9   :  { %v115_v45 = vadd.f32 %v99_v28, %v83_v34  ;;  %v116_v46 = vadd.f32 %v100_v29, %v84_v35  ;;  %v117_v50 = vadd.f32 %v101_v36, %v85_v40  ;;  %v118_v51 = vadd.f32 %v102_v37, %v86_v41  ;;  %v109_v26 = vld [vmem:[%s394_s3 + $0x70] sm:$0xff]  ;;  %v110_v27 = vld [vmem:[%s394_s3 + $0x78] sm:$0xff] }
   0xa   :  { %v127_v43 = vmax.f32 %v111_v32, 0.0  ;;  %v128_v44 = vmax.f32 %v112_v33, 0.0  ;;  %v129_v48 = vmax.f32 %v113_v38, 0.0  ;;  %v130_v49 = vmax.f32 %v114_v39, 0.0 }
   0xb   :  { %v131_v53 = vmax.f32 %v115_v45, 0.0  ;;  %v132_v54 = vmax.f32 %v116_v46, 0.0  ;;  %v183_v55 = vunpack.c.l.bf16 %v200_v42  ;;  %v184_v56 = vunpack.c.h.bf16 %v200_v42 }
   0xc   :  { %143 = vst [vmem:[%s395_s4] sm:$0xff] %v127_v43  ;;  %144 = vst [vmem:[%s395_s4 + $0x8] sm:$0xff] %v128_v44  ;;  %v133_v58 = vmax.f32 %v117_v50, 0.0  ;;  %v134_v59 = vmax.f32 %v118_v51, 0.0  ;;  %v187_v60 = vunpack.c.l.bf16 %v201_v47  ;;  %v188_v61 = vunpack.c.h.bf16 %v201_v47 }
   0xd   :  { %145 = vst [vmem:[%s395_s4 + $0x10] sm:$0xff] %v129_v48  ;;  %146 = vst [vmem:[%s395_s4 + $0x18] sm:$0xff] %v130_v49  ;;  %v64_v62 = vmul.f32 %v183_v55, %v235_v1  ;;  %v65_v63 = vmul.f32 %v184_v56, %v235_v1  ;;  %v191_v0 = vunpack.c.l.bf16 %v202_v52  ;;  %v192_v2 = vunpack.c.h.bf16 %v202_v52 }
   0xe   :  { %147 = vst [vmem:[%s395_s4 + $0x20] sm:$0xff] %v131_v53  ;;  %148 = vst [vmem:[%s395_s4 + $0x28] sm:$0xff] %v132_v54  ;;  %v66_v6 = vmul.f32 %v187_v60, %v235_v1  ;;  %v67_v7 = vmul.f32 %v188_v61, %v235_v1  ;;  %v195_v8 = vunpack.c.l.bf16 %v203_v57  ;;  %v196_v9 = vunpack.c.h.bf16 %v203_v57 }
   0xf   :  { %149 = vst [vmem:[%s395_s4 + $0x30] sm:$0xff] %v133_v58  ;;  %150 = vst [vmem:[%s395_s4 + $0x38] sm:$0xff] %v134_v59  ;;  %v87_v10 = vadd.f32 %v243_v5, %v64_v62  ;;  %v88_v11 = vadd.f32 %v243_v5, %v65_v63  ;;  %v68_v14 = vmul.f32 %v191_v0, %v235_v1 }
  0x10   :  { %v69_v15 = vmul.f32 %v192_v2, %v235_v1  ;;  %v89_v16 = vadd.f32 %v243_v5, %v66_v6  ;;  %v90_v17 = vadd.f32 %v243_v5, %v67_v7  ;;  %v70_v20 = vmul.f32 %v195_v8, %v235_v1 }
  0x11   :  { %v71_v21 = vmul.f32 %v196_v9, %v235_v1  ;;  %v119_v22 = vadd.f32 %v103_v3, %v87_v10  ;;  %v120_v23 = vadd.f32 %v104_v4, %v88_v11  ;;  %v91_v24 = vadd.f32 %v243_v5, %v68_v14 }
  0x12   :  { %v92_v25 = vadd.f32 %v243_v5, %v69_v15  ;;  %v121_v28 = vadd.f32 %v105_v12, %v89_v16  ;;  %v122_v29 = vadd.f32 %v106_v13, %v90_v17  ;;  %v93_v30 = vadd.f32 %v243_v5, %v70_v20 }
  0x13   :  { %v94_v1 = vadd.f32 %v243_v5, %v71_v21  ;;  %v135_v31 = vmax.f32 %v119_v22, 0.0  ;;  %v136_v32 = vmax.f32 %v120_v23, 0.0  ;;  %v123_v33 = vadd.f32 %v107_v18, %v91_v24 }
  0x14   :  { %v124_v34 = vadd.f32 %v108_v19, %v92_v25  ;;  %v137_v35 = vmax.f32 %v121_v28, 0.0  ;;  %v138_v36 = vmax.f32 %v122_v29, 0.0  ;;  %v125_v37 = vadd.f32 %v109_v26, %v93_v30 }
  0x15   :  { %v126_v38 = vadd.f32 %v110_v27, %v94_v1  ;;  %151 = vst [vmem:[%s395_s4 + $0x40] sm:$0xff] %v135_v31  ;;  %152 = vst [vmem:[%s395_s4 + $0x48] sm:$0xff] %v136_v32  ;;  %v139_v39 = vmax.f32 %v123_v33, 0.0 }
  0x16   :  { %v140_v40 = vmax.f32 %v124_v34, 0.0  ;;  %153 = vst [vmem:[%s395_s4 + $0x50] sm:$0xff] %v137_v35  ;;  %154 = vst [vmem:[%s395_s4 + $0x58] sm:$0xff] %v138_v36  ;;  %v141_v5 = vmax.f32 %v125_v37, 0.0 }
  0x17   :  { %v142_v41 = vmax.f32 %v126_v38, 0.0  ;;  %155 = vst [vmem:[%s395_s4 + $0x60] sm:$0xff] %v139_v39 }
  0x18   :  { %156 = vst [vmem:[%s395_s4 + $0x68] sm:$0xff] %v140_v40  ;;  %157 = vst [vmem:[%s395_s4 + $0x70] sm:$0xff] %v141_v5 }
  0x19   :  { %158 = vst [vmem:[%s395_s4 + $0x78] sm:$0xff] %v142_v41 }

</bundles_post_ra>
